<compile_context>
chip_gen: v6e
topology: v6e:2x2x1
jax: 0.10.0
libtpu: 0.0.40
codegen_flags: <defaults>
</compile_context>

<pallas_src>
import jax
import jax.numpy as jnp
from jax.experimental import pallas as pl
from jax.experimental.pallas import tpu as pltpu

INPUT_SIZE = 16
HIDDEN_SIZE = 32
OUTPUT_SIZE = 8
BN_EPS = 1e-5
LANE = 128                     # lane width; also == 4 * HIDDEN_SIZE here
GATE_W = 4 * HIDDEN_SIZE       # 128


def _round_up(n, m):
    return (n + m - 1) // m * m


# ----------------------------- kernel ---------------------------------------


def _lstm_cell_from_zero(x, w_t, b, H):
    """One LSTM step with h0 = c0 = 0.

    The recurrent term W_hh @ h0 is exactly zero and the f-gate multiplies
    c0 == 0, so only the input projection + (b_ih + b_hh) survive.
    Gate columns of w_t / b are pre-reordered to [i, g, o, f].
    """
    z = jnp.dot(x, w_t, preferred_element_type=jnp.float32) + b
    i = jax.nn.sigmoid(z[:, 0 * H:1 * H])
    g = jnp.tanh(z[:, 1 * H:2 * H])
    o = jax.nn.sigmoid(z[:, 2 * H:3 * H])
    return o * jnp.tanh(i * g)


def lstm_model_kernel(x_ref, w_ref, b_ref, out_ref):
    I, H = INPUT_SIZE, HIDDEN_SIZE
    x = x_ref[...]                              # (TILE_B, I)

    # Static, sublane-aligned slices of the packed parameter slabs.
    w1 = w_ref[0:I, :]                          # (I, 4H)   layer-1 input proj
    w2 = w_ref[I:I + H, :]                      # (H, 4H)   layer-2 input proj
    fcw = w_ref[I + H:I + 2 * H, :]             # (H, 128)  BN-folded, 0-padded
    b1 = b_ref[0:1, :]
    b2 = b_ref[1:2, :]
    fcb = b_ref[2:3, :]                         # (1, 128)  BN-folded, 0-padded

    h1 = _lstm_cell_from_zero(x, w1, b1, H)     # LSTM layer 1 (seq_len == 1)
    h2 = _lstm_cell_from_zero(h1, w2, b2, H)    # LSTM layer 2

    # x[:, -1, :] is just h2 (seq_len == 1).
    # Dropout: inference mode -> identity.
    # BatchNorm1d (inference, running stats): folded into fcw/fcb on the host.
    # TODO(synk): training-mode Dropout / batch-statistics BatchNorm not implemented.
    y = jnp.dot(h2, fcw, preferred_element_type=jnp.float32) + fcb
    out_ref[...] = jnp.maximum(y, 0.0)          # ReLU; padded cols stay 0


# ----------------------------- wrapper ---------------------------------------


def lstm_model_forward(x, packed):
    """x: (B, INPUT_SIZE) f32 -> (B, OUTPUT_SIZE) f32."""
    B = x.shape[0]
    tile_b = 128 if B >= 128 else _round_up(B, 8)
    pB = _round_up(B, tile_b)
    if pB != B:
        x = jnp.pad(x, ((0, pB - B), (0, 0)))
    grid = (pB // tile_b,)

    out = pl.pallas_call(
        lstm_model_kernel,
        out_shape=jax.ShapeDtypeStruct((pB, LANE), jnp.float32),
        grid=grid,
        in_specs=[
            pl.BlockSpec((tile_b, INPUT_SIZE), lambda i: (i, 0)),   # tiled x
            pl.BlockSpec(packed["W"].shape, lambda i: (0, 0)),      # resident
            pl.BlockSpec(packed["B"].shape, lambda i: (0, 0)),      # resident
        ],
        out_specs=pl.BlockSpec((tile_b, LANE), lambda i: (i, 0)),
        compiler_params=pltpu.CompilerParams(
            dimension_semantics=("parallel",)),
    )(x, packed["W"], packed["B"])
    return out[:B, :OUTPUT_SIZE]


# --------------------------- param handling ----------------------------------


def init_params(key):
    """PyTorch-layout parameters (gate order [i, f, g, o], W_hh included)."""
    ks = jax.random.split(key, 14)
    H, I, O = HIDDEN_SIZE, INPUT_SIZE, OUTPUT_SIZE
    kb = 1.0 / jnp.sqrt(jnp.float32(H))

    def u(k, shape, bound):
        return jax.random.uniform(k, shape, jnp.float32, -bound, bound)

    p = dict(
        # nn.LSTM(input_size, hidden)
        w_ih1=u(ks[0], (4 * H, I), kb), w_hh1=u(ks[1], (4 * H, H), kb),
        b_ih1=u(ks[2], (4 * H,), kb), b_hh1=u(ks[3], (4 * H,), kb),
        # nn.LSTM(hidden, hidden)
        w_ih2=u(ks[4], (4 * H, H), kb), w_hh2=u(ks[5], (4 * H, H), kb),
        b_ih2=u(ks[6], (4 * H,), kb), b_hh2=u(ks[7], (4 * H,), kb),
        # nn.Linear(hidden, output)
        fc_w=u(ks[8], (O, H), kb), fc_b=u(ks[9], (O,), kb),
        # nn.BatchNorm1d(hidden) running state (non-trivial, to exercise the fold)
        gamma=jax.random.uniform(ks[10], (H,), jnp.float32, 0.5, 1.5),
        beta=0.1 * jax.random.normal(ks[11], (H,), jnp.float32),
        rmean=0.1 * jax.random.normal(ks[12], (H,), jnp.float32),
        rvar=jax.random.uniform(ks[13], (H,), jnp.float32, 0.5, 1.5),
    )
    return p


def pack_params(p):
    """Fold BN into FC, reorder gates to [i,g,o,f], pack into 2 VMEM slabs."""
    H, I, O = HIDDEN_SIZE, INPUT_SIZE, OUTPUT_SIZE

    def reorder_gates(a):  # leading dim 4H in PyTorch order [i, f, g, o]
        return jnp.concatenate(
            [a[0 * H:1 * H], a[2 * H:3 * H], a[3 * H:4 * H], a[1 * H:2 * H]],
            axis=0)

    w1_t = reorder_gates(p["w_ih1"]).T                    # (I, 4H)
    b1 = reorder_gates(p["b_ih1"] + p["b_hh1"])           # (4H,)
    w2_t = reorder_gates(p["w_ih2"]).T                    # (H, 4H)
    b2 = reorder_gates(p["b_ih2"] + p["b_hh2"])           # (4H,)

    # Fold inference BatchNorm into the FC layer.
    scale = p["gamma"] * jax.lax.rsqrt(p["rvar"] + BN_EPS)          # (H,)
    shift = p["beta"] - p["rmean"] * scale                          # (H,)
    fcw_t = p["fc_w"].T * scale[:, None]                            # (H, O)
    fcb = p["fc_b"] + shift @ p["fc_w"].T                           # (O,)

    # Zero-pad FC to a lane-dense 128-wide output.
    fcw_pad = jnp.zeros((H, LANE), jnp.float32).at[:, :O].set(fcw_t)
    fcb_pad = jnp.zeros((LANE,), jnp.float32).at[:O].set(fcb)

    W = jnp.concatenate([w1_t, w2_t, fcw_pad], axis=0)              # (I+2H, 128)
    Bz = jnp.zeros((8, LANE), jnp.float32)
    Bz = Bz.at[0, :].set(b1).at[1, :].set(b2).at[2, :].set(fcb_pad)
    return {"W": W, "B": Bz}


# ----------------------------- reference -------------------------------------


def lstm_model_reference(x, p):
    """Full-semantics pure-JAX reference (explicit W_hh@h0, f*c0, un-folded BN)."""
    H = HIDDEN_SIZE
    B = x.shape[0]

    def full_cell(xin, w_ih, w_hh, b_ih, b_hh, h0, c0):
        z = xin @ w_ih.T + h0 @ w_hh.T + b_ih + b_hh
        i = jax.nn.sigmoid(z[:, 0 * H:1 * H])
        f = jax.nn.sigmoid(z[:, 1 * H:2 * H])
        g = jnp.tanh(z[:, 2 * H:3 * H])
        o = jax.nn.sigmoid(z[:, 3 * H:4 * H])
        c = f * c0 + i * g
        return o * jnp.tanh(c), c

    z0 = jnp.zeros((B, H), jnp.float32)
    h1, _ = full_cell(x, p["w_ih1"], p["w_hh1"], p["b_ih1"], p["b_hh1"], z0, z0)
    h2, _ = full_cell(h1, p["w_ih2"], p["w_hh2"], p["b_ih2"], p["b_hh2"], z0, z0)
    # Dropout: eval -> identity.
    hn = (h2 - p["rmean"]) * jax.lax.rsqrt(p["rvar"] + BN_EPS)
    hn = hn * p["gamma"] + p["beta"]
    return jnp.maximum(hn @ p["fc_w"].T + p["fc_b"], 0.0)


# ------------------------------- main -----------------------------------------


if __name__ == "__main__":
    key = jax.random.PRNGKey(0)
    kx1, kx2, kp = jax.random.split(key, 3)
    params = init_params(kp)
    packed = pack_params(params)

    # Small batch (single grid step, tile == batch).
    x_small = jax.random.normal(kx1, (8, INPUT_SIZE), jnp.float32)
    out_small = jax.block_until_ready(lstm_model_forward(x_small, packed))
    ref_small = lstm_model_reference(x_small, params)
    assert out_small.shape == (8, OUTPUT_SIZE)
    assert jnp.allclose(out_small, ref_small, atol=1e-5, rtol=1e-5)

    # Batched path: ragged batch padded to 2 x 128-row tiles, weights resident.
    x_big = jax.random.normal(kx2, (200, INPUT_SIZE), jnp.float32)
    out_big = jax.block_until_ready(lstm_model_forward(x_big, packed))
    ref_big = lstm_model_reference(x_big, params)
    assert out_big.shape == (200, OUTPUT_SIZE)
    assert jnp.allclose(out_big, ref_big, atol=1e-5, rtol=1e-5)

    print("KERNEL_OK")
</pallas_src>

<mosaic_0001>
module attributes {stable_mosaic.version = 11 : i64} {
  func.func @lstm_model_kernel(%arg0: i32, %arg1: memref<8x16xf32, #tpu.memory_space<vmem>>, %arg2: memref<80x128xf32, #tpu.memory_space<vmem>>, %arg3: memref<8x128xf32, #tpu.memory_space<vmem>>, %arg4: memref<8x128xf32, #tpu.memory_space<vmem>>) attributes {dimension_semantics = [#tpu.dimension_semantics<parallel>], iteration_bounds = array<i64: 1>, scalar_prefetch = 0 : i64, scratch_operands = 0 : i64, tpu.core_type = #tpu.core_type<tc>, window_params = [{transform_indices = @transform_0, window_bounds = array<i64: 8, 16>}, {pipeline_mode = #tpu.pipeline_mode<synchronous>, transform_indices = @transform_1, window_bounds = array<i64: 80, 128>}, {pipeline_mode = #tpu.pipeline_mode<synchronous>, transform_indices = @transform_2, window_bounds = array<i64: 8, 128>}, {transform_indices = @transform_3, window_bounds = array<i64: 8, 128>}]} {
    %c0 = arith.constant 0 : index
    %c0_0 = arith.constant 0 : index
    %0 = vector.load %arg1[%c0, %c0_0] : memref<8x16xf32, #tpu.memory_space<vmem>>, vector<8x16xf32>
    %c0_1 = arith.constant 0 : index
    %c0_2 = arith.constant 0 : index
    %1 = vector.load %arg2[%c0_1, %c0_2] : memref<80x128xf32, #tpu.memory_space<vmem>>, vector<16x128xf32>
    %c16 = arith.constant 16 : index
    %c0_3 = arith.constant 0 : index
    %2 = vector.load %arg2[%c16, %c0_3] : memref<80x128xf32, #tpu.memory_space<vmem>>, vector<32x128xf32>
    %c48 = arith.constant 48 : index
    %c0_4 = arith.constant 0 : index
    %3 = vector.load %arg2[%c48, %c0_4] : memref<80x128xf32, #tpu.memory_space<vmem>>, vector<32x128xf32>
    %c0_5 = arith.constant 0 : index
    %c0_6 = arith.constant 0 : index
    %4 = vector.load %arg3[%c0_5, %c0_6] : memref<8x128xf32, #tpu.memory_space<vmem>>, vector<1x128xf32>
    %c1 = arith.constant 1 : index
    %c0_7 = arith.constant 0 : index
    %5 = vector.load %arg3[%c1, %c0_7] : memref<8x128xf32, #tpu.memory_space<vmem>>, vector<1x128xf32>
    %c2 = arith.constant 2 : index
    %c0_8 = arith.constant 0 : index
    %6 = vector.load %arg3[%c2, %c0_8] : memref<8x128xf32, #tpu.memory_space<vmem>>, vector<1x128xf32>
    %cst = arith.constant dense<0.000000e+00> : vector<8x128xf32>
    %7 = tpu.matmul %0, %1, %cst {dimension_numbers = #tpu.dot_dimension_numbers<[1], [0], [0], [1], [0, 0, 1, 1], [], []>} : vector<8x16xf32>, vector<16x128xf32>, vector<8x128xf32> -> vector<8x128xf32>
    %8 = vector.broadcast %4 : vector<1x128xf32> to vector<8x128xf32>
    %9 = arith.addf %7, %8 : vector<8x128xf32>
    %10 = vector.extract_strided_slice %9 {offsets = [0, 0], sizes = [8, 32], strides = [1, 1]} : vector<8x128xf32> to vector<8x32xf32>
    %11 = arith.negf %10 : vector<8x32xf32>
    %12 = math.exp %11 : vector<8x32xf32>
    %cst_9 = arith.constant 1.000000e+00 : f32
    %13 = vector.broadcast %cst_9 : f32 to vector<8x32xf32>
    %14 = arith.addf %13, %12 : vector<8x32xf32>
    %15 = arith.divf %13, %14 : vector<8x32xf32>
    %16 = vector.extract_strided_slice %9 {offsets = [0, 32], sizes = [8, 32], strides = [1, 1]} : vector<8x128xf32> to vector<8x32xf32>
    %17 = math.tanh %16 : vector<8x32xf32>
    %18 = vector.extract_strided_slice %9 {offsets = [0, 64], sizes = [8, 32], strides = [1, 1]} : vector<8x128xf32> to vector<8x32xf32>
    %19 = arith.negf %18 : vector<8x32xf32>
    %20 = math.exp %19 : vector<8x32xf32>
    %cst_10 = arith.constant 1.000000e+00 : f32
    %21 = vector.broadcast %cst_10 : f32 to vector<8x32xf32>
    %22 = arith.addf %21, %20 : vector<8x32xf32>
    %23 = arith.divf %21, %22 : vector<8x32xf32>
    %24 = arith.mulf %15, %17 : vector<8x32xf32>
    %25 = math.tanh %24 : vector<8x32xf32>
    %26 = arith.mulf %23, %25 : vector<8x32xf32>
    %cst_11 = arith.constant dense<0.000000e+00> : vector<8x128xf32>
    %27 = tpu.matmul %26, %2, %cst_11 {dimension_numbers = #tpu.dot_dimension_numbers<[1], [0], [0], [1], [0, 0, 1, 1], [], []>} : vector<8x32xf32>, vector<32x128xf32>, vector<8x128xf32> -> vector<8x128xf32>
    %28 = vector.broadcast %5 : vector<1x128xf32> to vector<8x128xf32>
    %29 = arith.addf %27, %28 : vector<8x128xf32>
    %30 = vector.extract_strided_slice %29 {offsets = [0, 0], sizes = [8, 32], strides = [1, 1]} : vector<8x128xf32> to vector<8x32xf32>
    %31 = arith.negf %30 : vector<8x32xf32>
    %32 = math.exp %31 : vector<8x32xf32>
    %cst_12 = arith.constant 1.000000e+00 : f32
    %33 = vector.broadcast %cst_12 : f32 to vector<8x32xf32>
    %34 = arith.addf %33, %32 : vector<8x32xf32>
    %35 = arith.divf %33, %34 : vector<8x32xf32>
    %36 = vector.extract_strided_slice %29 {offsets = [0, 32], sizes = [8, 32], strides = [1, 1]} : vector<8x128xf32> to vector<8x32xf32>
    %37 = math.tanh %36 : vector<8x32xf32>
    %38 = vector.extract_strided_slice %29 {offsets = [0, 64], sizes = [8, 32], strides = [1, 1]} : vector<8x128xf32> to vector<8x32xf32>
    %39 = arith.negf %38 : vector<8x32xf32>
    %40 = math.exp %39 : vector<8x32xf32>
    %cst_13 = arith.constant 1.000000e+00 : f32
    %41 = vector.broadcast %cst_13 : f32 to vector<8x32xf32>
    %42 = arith.addf %41, %40 : vector<8x32xf32>
    %43 = arith.divf %41, %42 : vector<8x32xf32>
    %44 = arith.mulf %35, %37 : vector<8x32xf32>
    %45 = math.tanh %44 : vector<8x32xf32>
    %46 = arith.mulf %43, %45 : vector<8x32xf32>
    %cst_14 = arith.constant dense<0.000000e+00> : vector<8x128xf32>
    %47 = tpu.matmul %46, %3, %cst_14 {dimension_numbers = #tpu.dot_dimension_numbers<[1], [0], [0], [1], [0, 0, 1, 1], [], []>} : vector<8x32xf32>, vector<32x128xf32>, vector<8x128xf32> -> vector<8x128xf32>
    %48 = vector.broadcast %6 : vector<1x128xf32> to vector<8x128xf32>
    %49 = arith.addf %47, %48 : vector<8x128xf32>
    %cst_15 = arith.constant 0.000000e+00 : f32
    %50 = vector.broadcast %cst_15 : f32 to vector<8x128xf32>
    %51 = arith.maximumf %49, %50 : vector<8x128xf32>
    %c0_16 = arith.constant 0 : index
    %c0_17 = arith.constant 0 : index
    %52 = vector.load %arg4[%c0_16, %c0_17] : memref<8x128xf32, #tpu.memory_space<vmem>>, vector<8x128xf32>
    tpu.vector_store %arg4[%c0_16, %c0_17], %51 {strides = array<i32>} : memref<8x128xf32, #tpu.memory_space<vmem>>, vector<8x128xf32>,
    return
  }
  func.func @transform_0(%arg0: i32) -> (i32, i32) {
    %c0_i32 = arith.constant 0 : i32
    %c0_i32_0 = arith.constant 0 : i32
    return %arg0, %c0_i32 : i32, i32
  }
  func.func @transform_1(%arg0: i32) -> (i32, i32) {
    %c0_i32 = arith.constant 0 : i32
    %c0_i32_0 = arith.constant 0 : i32
    %c0_i32_1 = arith.constant 0 : i32
    return %c0_i32, %c0_i32_0 : i32, i32
  }
  func.func @transform_2(%arg0: i32) -> (i32, i32) {
    %c0_i32 = arith.constant 0 : i32
    %c0_i32_0 = arith.constant 0 : i32
    %c0_i32_1 = arith.constant 0 : i32
    return %c0_i32, %c0_i32_0 : i32, i32
  }
  func.func @transform_3(%arg0: i32) -> (i32, i32) {
    %c0_i32 = arith.constant 0 : i32
    %c0_i32_0 = arith.constant 0 : i32
    return %arg0, %c0_i32 : i32, i32
  }
}

</mosaic_0001>

<bundles_post_ra>
// kernel: tpu_custom_call.1
= control target key start
LH: loop header
LB: loop body
LE: loop exit
PB: predicated region body
PF: predicated region fallthrough
CT: control target
= control target key end

     0   :  { %8 = vsyncpa [#allocation3], 0  ;;  %s582_s0 = inlined_call_operand.hbm [shape: f32[8,16], index: 0, kind: input, shape index: {}]   ;;  %s583_s1 = inlined_call_operand.hbm [shape: f32[80,128], index: 1, kind: input, shape index: {}]   ;;  %s584_s2 = inlined_call_operand.hbm [shape: f32[8,128], index: 2, kind: input, shape index: {}]   ;;  %s585_s3 = inlined_call_operand.hbm [shape: f32[8,128], index: 3, kind: output, shape index: {}]  }
   0x1   :  { %9 = vsyncpa [#allocation6], 0 }
   0x2   :  { %10 = vsyncpa [#allocation4], 0  ;;  %s519_s12 = smov [#allocation5]  }
   0x3   :  { %s26_s13 = sshll.u32 %s519_s12, 4  ;;  %s27_s13 = int_to_ptr.vmem [resolvable:$true] %s26_s13 }
   0x4   :  { %s441_s14 = scalar_lea.vmem %s27_s13, 1280  ;;  %p446_p1 = scmp.lt.s32.totalorder %s27_s13, %s27_s13 }
   0x5   :  { %p442_p0 = scmp.ne.s32.totalorder %s27_s13, %s441_s14  ;;  %p447_p2 = scmp.lt.s32.totalorder %s441_s14, %s441_s14 }
   0x7   :  { %p448_p3 = por %p447_p2, %p446_p1 }
   0x9   :  { %p449_p4 = pnand %p448_p3, %p442_p0 }
   0xb   :  { %452 = shalt.err (!%p449_p4)
}
   0xc   :  { %s520_s15 = smov 128   ;;  %s521_s16 = smov 8  }
   0xd   :  { %32 = dma.hbm_to_vmem [thread:$0]  %s583_s1, 1280, %s27_s13, [#allocation6], %s520_s15, %s520_s15, %s521_s16  }
   0xe   :  { %s522_s19 = smov [#allocation2]   ;;  %s523_s21 = smov [#allocation7]  }
   0xf   :  { %s17_s20 = sshll.u32 %s522_s19, 4  ;;  %s39_s22 = sshll.u32 %s523_s21, 4  ;;  %s18_s20 = int_to_ptr.vmem [resolvable:$true] %s17_s20  ;;  %s40_s22 = int_to_ptr.vmem [resolvable:$true] %s39_s22 }
  0x10   :  { %s461_s23 = scalar_lea.vmem %s18_s20, 128  ;;  %p466_p6 = scmp.lt.s32.totalorder %s18_s20, %s18_s20 }
  0x11   :  { %p462_p5 = scmp.ne.s32.totalorder %s18_s20, %s461_s23  ;;  %p467_p7 = scmp.lt.s32.totalorder %s461_s23, %s461_s23 }
  0x13   :  { %p468_p8 = por %p467_p7, %p466_p6 }
  0x15   :  { %p469_p9 = pnand %p468_p8, %p462_p5 }
  0x17   :  { %472 = shalt.err (!%p469_p9)
}
  0x18   :  { %20 = dma.hbm_to_vmem [thread:$0]  %s582_s0, 128, %s18_s20, [#allocation3]  }
  0x19   :  { %s481_s26 = scalar_lea.vmem %s40_s22, 128  ;;  %p486_p11 = scmp.lt.s32.totalorder %s40_s22, %s40_s22 }
  0x1a   :  { %p482_p10 = scmp.ne.s32.totalorder %s40_s22, %s481_s26  ;;  %p487_p12 = scmp.lt.s32.totalorder %s481_s26, %s481_s26 }
  0x1c   :  { %p488_p13 = por %p487_p12, %p486_p11 }
  0x1e   :  { %p489_p0 = pnand %p488_p13, %p482_p10 }
  0x20   :  { %492 = shalt.err (!%p489_p0)
}
  0x21   :  { %42 = dma.hbm_to_vmem [thread:$0]  %s584_s2, 128, %s40_s22, [#allocation6]  }
  0x22   :  { %513 = dma.done.wait [#allocation3], 128  }
  0x23   :  { %514 = vsyncadd [#allocation3], 4294967168 }
  0x24   :  { %515 = dma.done.wait [#allocation6], 1408  }
  0x25   :  { %516 = vsyncadd [#allocation6], 4294965888  ;;  %v524_v0 = vmov 0.0   ;;  %vm525_vm0 = vmmov 0   ;;  %v54_v1 = vld [vmem:[#allocation5 + $0x8] sm:$0xff]  ;;  %v53_v2 = vld [vmem:[#allocation5] sm:$0xff] }
  0x26   :  { %378 = vmatprep.subr.mxu0 %v524_v0  ;;  %382 = vmatprep.mubr.msk.f32.mxu0 %vm525_vm0, %v524_v0  ;;  %v52_v3 = vld [vmem:[#allocation2] sm:$0xff]  ;;  %vm70_vm1 = vcmask 130048   ;;  %v357_v4 = vld [vmem:[#allocation7] ss:$0 sm:$0xff]  ;;  %s526_s0 = smov 96   ;;  %v58_v15 = vld [vmem:[#allocation5 + $0x28] sm:$0xff] }
  0x27   :  { %385 = vmatprep.subr.mxu1 %v524_v0  ;;  %393 = vmatprep.mubr.msk.f32.mxu1 %vm525_vm0, %v524_v0  ;;  %v57_v16 = vld [vmem:[#allocation5 + $0x20] sm:$0xff]  ;;  %v56_v17 = vld [vmem:[#allocation5 + $0x18] sm:$0xff]  ;;  %v55_v18 = vld [vmem:[#allocation5 + $0x10] sm:$0xff]  ;;  %s527_s2 = smov 64   ;;  %vm169_vm2 = vcmask 261120   ;;  %s528_s28 = smov [#allocation8]  }
  0x28   :  { %379 = vmatpush3.msra.mxu0 %v54_v1  ;;  %386 = vmatpush3.msra.mxu1 %v58_v15  ;;  %v360_v23 = vld [vmem:[#allocation7 + $0x1] ss:$0 sm:$0xff]  ;;  %v62_v34 = vld [vmem:[#allocation5 + $0x48] sm:$0xff]  ;;  %v61_v35 = vld [vmem:[#allocation5 + $0x40] sm:$0xff]  ;;  %s347_s29 = sshll.u32 %s528_s28, 4  ;;  %s348_s29 = int_to_ptr.vmem [resolvable:$true] %s347_s29 }
  0x29   :  { %380 = vmatprep.subr.mxu0 %v524_v0  ;;  %387 = vmatprep.subr.mxu1 %v524_v0  ;;  %v60_v36 = vld [vmem:[#allocation5 + $0x38] sm:$0xff]  ;;  %v59_v37 = vld [vmem:[#allocation5 + $0x30] sm:$0xff]  ;;  %s493_s30 = scalar_lea.vmem %s348_s29, 128  ;;  %p498_p2 = scmp.lt.s32.totalorder %s348_s29, %s348_s29 }
  0x2a   :  { %381 = vmatpush3.msra.mxu0 %v53_v2  ;;  %388 = vmatpush3.msra.mxu1 %v57_v16  ;;  %v363_v42 = vld [vmem:[#allocation7 + $0x2] ss:$0 sm:$0xff]  ;;  %p494_p1 = scmp.ne.s32.totalorder %s348_s29, %s493_s30  ;;  %p499_p3 = scmp.lt.s32.totalorder %s493_s30, %s493_s30 }
  0x2b   :  { %383 = vmatmul.mubr.msk.f32.vlgmr.msra.gmra.mxu0 %vm70_vm1, %v52_v3  ;;  %396 = vmatprep.subr.mxu0 %v524_v0 }
  0x2c   :  { %404 = vmatprep.mubr.msk.f32.mxu0 %vm525_vm0, %v524_v0  ;;  %389 = vmatprep.subr.mxu1 %v524_v0  ;;  %p500_p4 = por %p499_p3, %p498_p2 }
  0x2d   :  { %390 = vmatpush3.msra.mxu1 %v56_v17  ;;  %397 = vmatpush3.msra.mxu0 %v62_v34 }
  0x2e   :  { %391 = vmatprep.subr.mxu1 %v524_v0  ;;  %398 = vmatprep.subr.mxu0 %v524_v0  ;;  %p501_p5 = pnand %p500_p4, %p494_p1 }
  0x2f   :  { %392 = vmatpush3.msra.mxu1 %v55_v18  ;;  %399 = vmatpush3.msra.mxu0 %v61_v35 }
  0x30   :  { %400 = vmatprep.subr.mxu0 %v524_v0 }
  0x31   :  { %401 = vmatpush3.msra.mxu0 %v60_v36 }
  0x32   :  { %402 = vmatprep.subr.mxu0 %v524_v0 }
  0x33   :  { %403 = vmatpush3.msra.mxu0 %v59_v37 }
  0xeb   :  { %v140_v5 = vpop.f32.mrf.mxu0 }
  0xec   :  { %v141_v6 = vadd.f32 %v357_v4, %v140_v5 }
  0xed   :  { %v384_v7 = vpop.f32.mrf.mxu0 }
  0xee   :  { %417 = vtanh.f32 %v141_v6  ;;  %v359_v9 = vmul.f32 -1.442695, %v141_v6 }
  0xf0   :  { %419 = vpow2.f32 %v359_v9 }
  0xfb   :  { %v418_v8 = vpop.eup %417 }
  0xfc   :  { %152 = vrot.lane.b32.xlu0 %v418_v8, %s526_s0 }
  0xfd   :  { %v420_v10 = vpop.eup %419 }
  0xfe   :  { %v147_v11 = vadd.f32 1.0, %v420_v10 }
 0x100   :  { %421 = vrcp.f32 %v147_v11 }
 0x10d   :  { %v422_v12 = vpop.eup %421 }
 0x16e   :  { %v153_v13 = vpop.permute.xlu0 %152 }
 0x16f   :  { %v155_v14 = vmul.f32 %v422_v12, %v153_v13 }
 0x171   :  { %423 = vtanh.f32 %v155_v14 }
 0x17e   :  { %v424_v19 = vpop.eup %423 }
 0x17f   :  { %158 = vrot.lane.b32.xlu0 %v424_v19, %s527_s2 }
 0x1f1   :  { %v159_v20 = vpop.permute.xlu0 %158 }
 0x1f2   :  { %v161_v21 = vmul.f32 %v422_v12, %v159_v20 }
 0x1f4   :  { %167 = vrot.lane.b32.xlu1 %v161_v21, %s527_s2 }
 0x266   :  { %v168_v22 = vpop.permute.xlu1 %167 }
 0x267   :  { %394 = vmatmul.mubr.msk.f32.vlgmr.msra.gmra.mxu1 %vm169_vm2, %v168_v22 }
 0x327   :  { %v238_v24 = vpop.f32.mrf.mxu1 }
 0x328   :  { %v239_v25 = vadd.f32 %v360_v23, %v238_v24 }
 0x329   :  { %v395_v26 = vpop.f32.mrf.mxu1 }
 0x32a   :  { %425 = vtanh.f32 %v239_v25  ;;  %v362_v28 = vmul.f32 -1.442695, %v239_v25 }
 0x32c   :  { %427 = vpow2.f32 %v362_v28 }
 0x337   :  { %v426_v27 = vpop.eup %425 }
 0x338   :  { %250 = vrot.lane.b32.xlu1 %v426_v27, %s526_s0 }
 0x339   :  { %v428_v29 = vpop.eup %427 }
 0x33a   :  { %v245_v30 = vadd.f32 1.0, %v428_v29 }
 0x33c   :  { %429 = vrcp.f32 %v245_v30 }
 0x349   :  { %v430_v31 = vpop.eup %429 }
 0x3aa   :  { %v251_v32 = vpop.permute.xlu1 %250 }
 0x3ab   :  { %v253_v33 = vmul.f32 %v430_v31, %v251_v32 }
 0x3ad   :  { %431 = vtanh.f32 %v253_v33 }
 0x3ba   :  { %v432_v38 = vpop.eup %431 }
 0x3bb   :  { %256 = vrot.lane.b32.xlu0 %v432_v38, %s527_s2 }
 0x42d   :  { %v257_v39 = vpop.permute.xlu0 %256 }
 0x42e   :  { %v259_v40 = vmul.f32 %v430_v31, %v257_v39 }
 0x430   :  { %265 = vrot.lane.b32.xlu1 %v259_v40, %s527_s2 }
 0x4a2   :  { %v266_v41 = vpop.permute.xlu1 %265 }
 0x4a3   :  { %405 = vmatmul.mubr.msk.f32.vlgmr.msra.gmra.mxu0 %vm169_vm2, %v266_v41 }
 0x563   :  { %v335_v43 = vpop.f32.mrf.mxu0 }
 0x564   :  { %v336_v44 = vadd.f32 %v363_v42, %v335_v43 }
 0x565   :  { %v406_v45 = vpop.f32.mrf.mxu0 }
 0x566   :  { %v339_v46 = vmax.f32 %v336_v44, 0.0 }
 0x568   :  { %340 = vst [vmem:[#allocation8] sm:$0xff] %v339_v46 }
 0x569   :  { %504 = shalt.err (!%p501_p5)
}
 0x56a   :  { %350 = dma.vmem_to_hbm [thread:$0]  %s348_s29, 128, %s585_s3, [#allocation4]  }
 0x56b   :  { %517 = dma.done.wait [#allocation4], 128  }
 0x56c   :  { %518 = vsyncadd [#allocation4], 4294967168 }
 0x56d   :  { %354 = vsyncpa [#allocation3], 1 }
 0x56e   :  { %355 = vsyncpa [#allocation6], 1 }
 0x56f   :  { %356 = vsyncpa [#allocation4], 1 }

</bundles_post_ra>
